<compile_context>
chip_gen: v6e
topology: v6e:2x2x1
jax: 0.10.0
libtpu: 0.0.40
codegen_flags: <defaults>
</compile_context>

<pallas_src>
import jax
import jax.numpy as jnp
from jax import lax
from jax.experimental import pallas as pl
from jax.experimental.pallas import tpu as pltpu

EPS = 1e-5                    # nn.BatchNorm1d default eps
INV_SQRT2 = 0.7071067811865476

IN_SIZE = 1
H1, H2 = 128, 64
H2P = 128                     # hidden-2 padded to a full lane width
OUT_SIZE = 1

# Abramowitz & Stegun 7.1.26 erf coefficients (max abs error ~1.5e-7).
_AS_P = 0.3275911
_AS_A1 = 0.254829592
_AS_A2 = -0.284496736
_AS_A3 = 1.421413741
_AS_A4 = -1.453152027
_AS_A5 = 1.061405429


def _gelu(x):
    """GELU to ~1e-7 of the exact erf form, with the transcendental on the EUP.

    erf(|z|) ~= 1 - poly(t) * exp(-z^2), t = 1/(1 + p|z|).  The exp goes to the
    EUP slot (idle otherwise); the remaining VALU work is ~6 FMAs + a select,
    versus the ~20+-op VALU polynomial lax.erf lowers to.
    """
    z = x * INV_SQRT2
    az = jnp.abs(z)
    t = 1.0 / (1.0 + _AS_P * az)
    poly = ((((_AS_A5 * t + _AS_A4) * t + _AS_A3) * t + _AS_A2) * t + _AS_A1) * t
    erf_abs = 1.0 - poly * jnp.exp(-(az * az))            # exp -> EUP
    erf = jnp.where(z >= 0.0, erf_abs, -erf_abs)
    return 0.5 * x * (1.0 + erf)


def _round_up(n, m):
    return ((n + m - 1) // m) * m


def mlp_kernel(x_ref, w1_ref, b1_ref, w2_ref, b2_ref, w3_ref, o_ref):
    x = x_ref[...]                                                   # (TB, 1) f32

    # Linear(1->128) with folded BN1: broadcast on the VPU, then GELU.
    h = x * w1_ref[...] + b1_ref[...]                                # (TB, 128)
    h = _gelu(h)
    # Dropout(0.1): identity in eval mode.

    # Linear(128->64, zero-padded to 128) with folded BN2: one MXU matmul, GELU.
    h = jnp.dot(h.astype(w2_ref.dtype), w2_ref[...],
                preferred_element_type=jnp.float32) + b2_ref[...]
    h = _gelu(h)                                                     # (TB, 128)
    # Dropout(0.1): identity in eval mode.

    # Linear(64->1) minus its bias (added wrapper-side): mul + lane reduction.
    o_ref[...] = jnp.sum(h * w3_ref[...], axis=-1, keepdims=True)


def init_params(key):
    """Deterministic parameters matching the PyTorch module's shapes."""
    ks = jax.random.split(key, 6)

    def linear(kw, kb, fan_in, fan_out):
        bound = 1.0 / jnp.sqrt(jnp.float32(fan_in))
        w = jax.random.uniform(kw, (fan_in, fan_out), jnp.float32, -bound, bound)
        b = jax.random.uniform(kb, (1, fan_out), jnp.float32, -bound, bound)
        return w, b

    w1, b1 = linear(ks[0], ks[1], IN_SIZE, H1)
    w2, b2 = linear(ks[2], ks[3], H1, H2)
    w3, b3 = linear(ks[4], ks[5], H2, OUT_SIZE)

    params = {
        "w1": w1, "b1": b1,
        "g1": jnp.ones((1, H1), jnp.float32), "be1": jnp.zeros((1, H1), jnp.float32),
        "m1": jnp.zeros((1, H1), jnp.float32), "v1": jnp.ones((1, H1), jnp.float32),
        "w2": w2, "b2": b2,
        "g2": jnp.ones((1, H2), jnp.float32), "be2": jnp.zeros((1, H2), jnp.float32),
        "m2": jnp.zeros((1, H2), jnp.float32), "v2": jnp.ones((1, H2), jnp.float32),
        "w3": w3, "b3": b3,
    }
    return params


def simple_mlp_forward(x, params, *, block_b=4096, matmul_dtype=jnp.float32):
    """x: (B, 1) float32 -> (B, 1) float32, eval-mode forward of SimpleMLP.

    matmul_dtype=jnp.bfloat16 is recommended on v5e (weaker MXU); it deviates
    ~1e-3 relative from the exact f32 reference, so it is off by default.
    """
    B = x.shape[0]

    # Batch tiling:
    #   * big tiles (default 4096 rows) amortize the ~0.35 us per-grid-step cost
    #   * always >= 2 tiles so the "parallel" axis shards across both v7x TCs
    #   * TB multiple of 8 keeps the (TB, 1) blocks sublane-aligned
    half = -(-B // 2)
    TB = max(8, min(block_b, _round_up(half, 8)))
    Bp = _round_up(B, TB)
    if Bp // TB < 2:
        Bp = 2 * TB

    xp = x.astype(jnp.float32)
    if Bp != B:
        xp = jnp.pad(xp, ((0, Bp - B), (0, 0)))

    # ---- fold eval-mode BatchNorm into the adjacent Linear (once, XLA side) ----
    s1 = lax.rsqrt(params["v1"] + EPS) * params["g1"]                 # (1, H1)
    w1f = params["w1"] * s1                                           # (1, H1)
    b1f = (params["b1"] - params["m1"]) * s1 + params["be1"]          # (1, H1)

    s2 = lax.rsqrt(params["v2"] + EPS) * params["g2"]                 # (1, H2)
    w2f = params["w2"] * s2                                           # (H1, H2)
    b2f = (params["b2"] - params["m2"]) * s2 + params["be2"]          # (1, H2)

    # Pad hidden dim 64 -> 128 (zero weight/bias columns, zero w3 rows) so the
    # matmul and the second GELU are lane-dense; pads contribute exactly zero.
    w2p = jnp.zeros((H1, H2P), jnp.float32).at[:, :H2].set(w2f).astype(matmul_dtype)
    b2p = jnp.zeros((1, H2P), jnp.float32).at[:, :H2].set(b2f)
    w3p = jnp.zeros((1, H2P), jnp.float32).at[:, :H2].set(params["w3"].T)

    grid = (Bp // TB,)

    out = pl.pallas_call(
        mlp_kernel,
        out_shape=jax.ShapeDtypeStruct((Bp, OUT_SIZE), jnp.float32),
        grid=grid,
        in_specs=[
            pl.BlockSpec((TB, 1), lambda i: (i, 0)),       # x tile (compact, 1 lane)
            pl.BlockSpec((1, H1), lambda i: (0, 0)),       # w1*s1   (resident)
            pl.BlockSpec((1, H1), lambda i: (0, 0)),       # b1'     (resident)
            pl.BlockSpec((H1, H2P), lambda i: (0, 0)),     # w2'     (resident)
            pl.BlockSpec((1, H2P), lambda i: (0, 0)),      # b2'     (resident)
            pl.BlockSpec((1, H2P), lambda i: (0, 0)),      # w3^T    (resident)
        ],
        out_specs=pl.BlockSpec((TB, OUT_SIZE), lambda i: (i, 0)),
        compiler_params=pltpu.CompilerParams(
            dimension_semantics=("parallel",),
        ),
    )(xp, w1f, b1f, w2p, b2p, w3p)

    # Final-layer bias added here (cheaper than a (1,1) VMEM block per step).
    return out[:B] + params["b3"]


def reference_forward(x, params):
    """Pure-JAX reference (eval-mode SimpleMLP, unfolded BN, exact erf GELU)."""
    h = x @ params["w1"] + params["b1"]
    h = (h - params["m1"]) * lax.rsqrt(params["v1"] + EPS) * params["g1"] + params["be1"]
    h = 0.5 * h * (1.0 + lax.erf(h * INV_SQRT2))
    h = h @ params["w2"] + params["b2"]
    h = (h - params["m2"]) * lax.rsqrt(params["v2"] + EPS) * params["g2"] + params["be2"]
    h = 0.5 * h * (1.0 + lax.erf(h * INV_SQRT2))
    return h @ params["w3"] + params["b3"]


if __name__ == "__main__":
    key = jax.random.PRNGKey(0)
    k_param, k_x = jax.random.split(key)

    params = init_params(k_param)
    x = jax.random.normal(k_x, (8, IN_SIZE), jnp.float32)   # batch=8, input_size=1

    y = simple_mlp_forward(x, params)
    jax.block_until_ready(y)

    y_ref = reference_forward(x, params)
    assert y.shape == (8, OUT_SIZE)
    assert jnp.allclose(y, y_ref, atol=2e-5, rtol=2e-5)

    print("KERNEL_OK")
</pallas_src>

<mosaic_0001>
module attributes {stable_mosaic.version = 11 : i64} {
  func.func @mlp_kernel(%arg0: i32, %arg1: memref<8x1xf32, #tpu.memory_space<vmem>>, %arg2: memref<1x128xf32, #tpu.memory_space<vmem>>, %arg3: memref<1x128xf32, #tpu.memory_space<vmem>>, %arg4: memref<128x128xf32, #tpu.memory_space<vmem>>, %arg5: memref<1x128xf32, #tpu.memory_space<vmem>>, %arg6: memref<1x128xf32, #tpu.memory_space<vmem>>, %arg7: memref<8x1xf32, #tpu.memory_space<vmem>>) attributes {dimension_semantics = [#tpu.dimension_semantics<parallel>], iteration_bounds = array<i64: 2>, scalar_prefetch = 0 : i64, scratch_operands = 0 : i64, tpu.core_type = #tpu.core_type<tc>, window_params = [{transform_indices = @transform_0, window_bounds = array<i64: 8, 1>}, {pipeline_mode = #tpu.pipeline_mode<synchronous>, transform_indices = @transform_1, window_bounds = array<i64: 1, 128>}, {pipeline_mode = #tpu.pipeline_mode<synchronous>, transform_indices = @transform_2, window_bounds = array<i64: 1, 128>}, {pipeline_mode = #tpu.pipeline_mode<synchronous>, transform_indices = @transform_3, window_bounds = array<i64: 128, 128>}, {pipeline_mode = #tpu.pipeline_mode<synchronous>, transform_indices = @transform_4, window_bounds = array<i64: 1, 128>}, {pipeline_mode = #tpu.pipeline_mode<synchronous>, transform_indices = @transform_5, window_bounds = array<i64: 1, 128>}, {transform_indices = @transform_6, window_bounds = array<i64: 8, 1>}]} {
    %c0 = arith.constant 0 : index
    %c0_0 = arith.constant 0 : index
    %0 = vector.load %arg1[%c0, %c0_0] : memref<8x1xf32, #tpu.memory_space<vmem>>, vector<8x1xf32>
    %c0_1 = arith.constant 0 : index
    %c0_2 = arith.constant 0 : index
    %1 = vector.load %arg2[%c0_1, %c0_2] : memref<1x128xf32, #tpu.memory_space<vmem>>, vector<1x128xf32>
    %2 = vector.broadcast %0 : vector<8x1xf32> to vector<8x128xf32>
    %3 = vector.broadcast %1 : vector<1x128xf32> to vector<8x128xf32>
    %4 = arith.mulf %2, %3 : vector<8x128xf32>
    %c0_3 = arith.constant 0 : index
    %c0_4 = arith.constant 0 : index
    %5 = vector.load %arg3[%c0_3, %c0_4] : memref<1x128xf32, #tpu.memory_space<vmem>>, vector<1x128xf32>
    %6 = vector.broadcast %5 : vector<1x128xf32> to vector<8x128xf32>
    %7 = arith.addf %4, %6 : vector<8x128xf32>
    %cst = arith.constant 0.707106769 : f32
    %8 = vector.broadcast %cst : f32 to vector<8x128xf32>
    %9 = arith.mulf %7, %8 : vector<8x128xf32>
    %10 = math.absf %9 : vector<8x128xf32>
    %cst_5 = arith.constant 0.327591091 : f32
    %11 = vector.broadcast %cst_5 : f32 to vector<8x128xf32>
    %12 = arith.mulf %11, %10 : vector<8x128xf32>
    %cst_6 = arith.constant 1.000000e+00 : f32
    %13 = vector.broadcast %cst_6 : f32 to vector<8x128xf32>
    %14 = arith.addf %13, %12 : vector<8x128xf32>
    %cst_7 = arith.constant 1.000000e+00 : f32
    %15 = vector.broadcast %cst_7 : f32 to vector<8x128xf32>
    %16 = arith.divf %15, %14 : vector<8x128xf32>
    %cst_8 = arith.constant 1.06140542 : f32
    %17 = vector.broadcast %cst_8 : f32 to vector<8x128xf32>
    %18 = arith.mulf %17, %16 : vector<8x128xf32>
    %cst_9 = arith.constant -1.45315206 : f32
    %19 = vector.broadcast %cst_9 : f32 to vector<8x128xf32>
    %20 = arith.addf %18, %19 : vector<8x128xf32>
    %21 = arith.mulf %20, %16 : vector<8x128xf32>
    %cst_10 = arith.constant 1.42141378 : f32
    %22 = vector.broadcast %cst_10 : f32 to vector<8x128xf32>
    %23 = arith.addf %21, %22 : vector<8x128xf32>
    %24 = arith.mulf %23, %16 : vector<8x128xf32>
    %cst_11 = arith.constant -0.284496725 : f32
    %25 = vector.broadcast %cst_11 : f32 to vector<8x128xf32>
    %26 = arith.addf %24, %25 : vector<8x128xf32>
    %27 = arith.mulf %26, %16 : vector<8x128xf32>
    %cst_12 = arith.constant 0.254829586 : f32
    %28 = vector.broadcast %cst_12 : f32 to vector<8x128xf32>
    %29 = arith.addf %27, %28 : vector<8x128xf32>
    %30 = arith.mulf %29, %16 : vector<8x128xf32>
    %31 = arith.mulf %10, %10 : vector<8x128xf32>
    %cst_13 = arith.constant 0.000000e+00 : f32
    %32 = vector.broadcast %cst_13 : f32 to vector<8x128xf32>
    %33 = arith.subf %32, %31 : vector<8x128xf32>
    %34 = math.exp %33 : vector<8x128xf32>
    %35 = arith.mulf %30, %34 : vector<8x128xf32>
    %cst_14 = arith.constant 1.000000e+00 : f32
    %36 = vector.broadcast %cst_14 : f32 to vector<8x128xf32>
    %37 = arith.subf %36, %35 : vector<8x128xf32>
    %cst_15 = arith.constant 0.000000e+00 : f32
    %38 = vector.broadcast %cst_15 : f32 to vector<8x128xf32>
    %39 = arith.cmpf oge, %9, %38 : vector<8x128xf32>
    %cst_16 = arith.constant 0.000000e+00 : f32
    %40 = vector.broadcast %cst_16 : f32 to vector<8x128xf32>
    %41 = arith.subf %40, %37 : vector<8x128xf32>
    %42 = arith.select %39, %37, %41 : vector<8x128xi1>, vector<8x128xf32>
    %cst_17 = arith.constant 5.000000e-01 : f32
    %43 = vector.broadcast %cst_17 : f32 to vector<8x128xf32>
    %44 = arith.mulf %43, %7 : vector<8x128xf32>
    %cst_18 = arith.constant 1.000000e+00 : f32
    %45 = vector.broadcast %cst_18 : f32 to vector<8x128xf32>
    %46 = arith.addf %45, %42 : vector<8x128xf32>
    %47 = arith.mulf %44, %46 : vector<8x128xf32>
    %c0_19 = arith.constant 0 : index
    %c0_20 = arith.constant 0 : index
    %48 = vector.load %arg4[%c0_19, %c0_20] : memref<128x128xf32, #tpu.memory_space<vmem>>, vector<128x128xf32>
    %cst_21 = arith.constant dense<0.000000e+00> : vector<8x128xf32>
    %49 = tpu.matmul %47, %48, %cst_21 {dimension_numbers = #tpu.dot_dimension_numbers<[1], [0], [0], [1], [0, 0, 1, 1], [], []>} : vector<8x128xf32>, vector<128x128xf32>, vector<8x128xf32> -> vector<8x128xf32>
    %c0_22 = arith.constant 0 : index
    %c0_23 = arith.constant 0 : index
    %50 = vector.load %arg5[%c0_22, %c0_23] : memref<1x128xf32, #tpu.memory_space<vmem>>, vector<1x128xf32>
    %51 = vector.broadcast %50 : vector<1x128xf32> to vector<8x128xf32>
    %52 = arith.addf %49, %51 : vector<8x128xf32>
    %cst_24 = arith.constant 0.707106769 : f32
    %53 = vector.broadcast %cst_24 : f32 to vector<8x128xf32>
    %54 = arith.mulf %52, %53 : vector<8x128xf32>
    %55 = math.absf %54 : vector<8x128xf32>
    %cst_25 = arith.constant 0.327591091 : f32
    %56 = vector.broadcast %cst_25 : f32 to vector<8x128xf32>
    %57 = arith.mulf %56, %55 : vector<8x128xf32>
    %cst_26 = arith.constant 1.000000e+00 : f32
    %58 = vector.broadcast %cst_26 : f32 to vector<8x128xf32>
    %59 = arith.addf %58, %57 : vector<8x128xf32>
    %cst_27 = arith.constant 1.000000e+00 : f32
    %60 = vector.broadcast %cst_27 : f32 to vector<8x128xf32>
    %61 = arith.divf %60, %59 : vector<8x128xf32>
    %cst_28 = arith.constant 1.06140542 : f32
    %62 = vector.broadcast %cst_28 : f32 to vector<8x128xf32>
    %63 = arith.mulf %62, %61 : vector<8x128xf32>
    %cst_29 = arith.constant -1.45315206 : f32
    %64 = vector.broadcast %cst_29 : f32 to vector<8x128xf32>
    %65 = arith.addf %63, %64 : vector<8x128xf32>
    %66 = arith.mulf %65, %61 : vector<8x128xf32>
    %cst_30 = arith.constant 1.42141378 : f32
    %67 = vector.broadcast %cst_30 : f32 to vector<8x128xf32>
    %68 = arith.addf %66, %67 : vector<8x128xf32>
    %69 = arith.mulf %68, %61 : vector<8x128xf32>
    %cst_31 = arith.constant -0.284496725 : f32
    %70 = vector.broadcast %cst_31 : f32 to vector<8x128xf32>
    %71 = arith.addf %69, %70 : vector<8x128xf32>
    %72 = arith.mulf %71, %61 : vector<8x128xf32>
    %cst_32 = arith.constant 0.254829586 : f32
    %73 = vector.broadcast %cst_32 : f32 to vector<8x128xf32>
    %74 = arith.addf %72, %73 : vector<8x128xf32>
    %75 = arith.mulf %74, %61 : vector<8x128xf32>
    %76 = arith.mulf %55, %55 : vector<8x128xf32>
    %cst_33 = arith.constant 0.000000e+00 : f32
    %77 = vector.broadcast %cst_33 : f32 to vector<8x128xf32>
    %78 = arith.subf %77, %76 : vector<8x128xf32>
    %79 = math.exp %78 : vector<8x128xf32>
    %80 = arith.mulf %75, %79 : vector<8x128xf32>
    %cst_34 = arith.constant 1.000000e+00 : f32
    %81 = vector.broadcast %cst_34 : f32 to vector<8x128xf32>
    %82 = arith.subf %81, %80 : vector<8x128xf32>
    %cst_35 = arith.constant 0.000000e+00 : f32
    %83 = vector.broadcast %cst_35 : f32 to vector<8x128xf32>
    %84 = arith.cmpf oge, %54, %83 : vector<8x128xf32>
    %cst_36 = arith.constant 0.000000e+00 : f32
    %85 = vector.broadcast %cst_36 : f32 to vector<8x128xf32>
    %86 = arith.subf %85, %82 : vector<8x128xf32>
    %87 = arith.select %84, %82, %86 : vector<8x128xi1>, vector<8x128xf32>
    %cst_37 = arith.constant 5.000000e-01 : f32
    %88 = vector.broadcast %cst_37 : f32 to vector<8x128xf32>
    %89 = arith.mulf %88, %52 : vector<8x128xf32>
    %cst_38 = arith.constant 1.000000e+00 : f32
    %90 = vector.broadcast %cst_38 : f32 to vector<8x128xf32>
    %91 = arith.addf %90, %87 : vector<8x128xf32>
    %92 = arith.mulf %89, %91 : vector<8x128xf32>
    %c0_39 = arith.constant 0 : index
    %c0_40 = arith.constant 0 : index
    %93 = vector.load %arg6[%c0_39, %c0_40] : memref<1x128xf32, #tpu.memory_space<vmem>>, vector<1x128xf32>
    %94 = vector.broadcast %93 : vector<1x128xf32> to vector<8x128xf32>
    %95 = arith.mulf %92, %94 : vector<8x128xf32>
    %cst_41 = arith.constant dense<0.000000e+00> : vector<8xf32>
    %96 = vector.multi_reduction <add>, %95, %cst_41 [1] : vector<8x128xf32> to vector<8xf32>
    %97 = vector.shape_cast %96 : vector<8xf32> to vector<8x1xf32>
    %c0_42 = arith.constant 0 : index
    %c0_43 = arith.constant 0 : index
    %98 = vector.load %arg7[%c0_42, %c0_43] : memref<8x1xf32, #tpu.memory_space<vmem>>, vector<8x1xf32>
    tpu.vector_store %arg7[%c0_42, %c0_43], %97 {strides = array<i32>} : memref<8x1xf32, #tpu.memory_space<vmem>>, vector<8x1xf32>,
    return
  }
  func.func @transform_0(%arg0: i32) -> (i32, i32) {
    %c0_i32 = arith.constant 0 : i32
    %c0_i32_0 = arith.constant 0 : i32
    return %arg0, %c0_i32 : i32, i32
  }
  func.func @transform_1(%arg0: i32) -> (i32, i32) {
    %c0_i32 = arith.constant 0 : i32
    %c0_i32_0 = arith.constant 0 : i32
    %c0_i32_1 = arith.constant 0 : i32
    return %c0_i32, %c0_i32_0 : i32, i32
  }
  func.func @transform_2(%arg0: i32) -> (i32, i32) {
    %c0_i32 = arith.constant 0 : i32
    %c0_i32_0 = arith.constant 0 : i32
    %c0_i32_1 = arith.constant 0 : i32
    return %c0_i32, %c0_i32_0 : i32, i32
  }
  func.func @transform_3(%arg0: i32) -> (i32, i32) {
    %c0_i32 = arith.constant 0 : i32
    %c0_i32_0 = arith.constant 0 : i32
    %c0_i32_1 = arith.constant 0 : i32
    return %c0_i32, %c0_i32_0 : i32, i32
  }
  func.func @transform_4(%arg0: i32) -> (i32, i32) {
    %c0_i32 = arith.constant 0 : i32
    %c0_i32_0 = arith.constant 0 : i32
    %c0_i32_1 = arith.constant 0 : i32
    return %c0_i32, %c0_i32_0 : i32, i32
  }
  func.func @transform_5(%arg0: i32) -> (i32, i32) {
    %c0_i32 = arith.constant 0 : i32
    %c0_i32_0 = arith.constant 0 : i32
    %c0_i32_1 = arith.constant 0 : i32
    return %c0_i32, %c0_i32_0 : i32, i32
  }
  func.func @transform_6(%arg0: i32) -> (i32, i32) {
    %c0_i32 = arith.constant 0 : i32
    %c0_i32_0 = arith.constant 0 : i32
    return %arg0, %c0_i32 : i32, i32
  }
}

</mosaic_0001>

<bundles_post_ra>
// kernel: tpu_custom_call.1
= control target key start
LH: loop header
LB: loop body
LE: loop exit
PB: predicated region body
PF: predicated region fallthrough
CT: control target
= control target key end

     0   :  { %11 = vsyncpa [#allocation3], 0  ;;  %s687_s21 = smov 0   ;;  %s737_s0 = inlined_call_operand.vmem [shape: f32[16,1], index: 0, kind: input, shape index: {}]   ;;  %s738_s1 = inlined_call_operand.vmem [shape: f32[1,128], index: 1, kind: input, shape index: {}]   ;;  %s739_s2 = inlined_call_operand.vmem [shape: f32[1,128], index: 2, kind: input, shape index: {}]   ;;  %s740_s3 = inlined_call_operand.hbm [shape: f32[128,128], index: 3, kind: input, shape index: {}]   ;;  %s741_s4 = inlined_call_operand.vmem [shape: f32[1,128], index: 4, kind: input, shape index: {}]   ;;  %s742_s5 = inlined_call_operand.vmem [shape: f32[1,128], index: 5, kind: input, shape index: {}]   ;;  %s743_s6 = inlined_call_operand.vmem [shape: f32[16,1], index: 6, kind: output, shape index: {}]  }
   0x1 LB: > { %s508_s22 = sadd.s32 4294967295, %s644_s21   ;;  %p510_p0 = scmp.ge.s32.totalorder %s644_s21, 1  ;;  %s644_s21 = sphi %s687_s21, %s17_s21  }
   0x2   : > { %p179_p1 = scmp.lt.s32.totalorder %s644_s21, 3  ;;  %s646_s23 = smov [#allocation2]  }
   0x3   : > { %s197_s24 = sshll.u32 %s646_s23, 4  ;;  %p583_p3 = scmp.eq.s32.totalorder %s508_s22, 0  ;;  %s198_s24 = int_to_ptr.vmem [resolvable:$true] %s197_s24 }
   0x4   : > { %p695_p2 = pnand %p510_p0, %p179_p1  ;;  %s619_s26 = scalar_lea.vmem %s198_s24, 2048 }
   0x5   : > { %p620_p7 = scmp.ne.s32.totalorder %s198_s24, %s619_s26  ;;  %p627_p10 = scmp.lt.s32.totalorder %s198_s24, %s198_s24 }
   0x6   : > { %p579_p4 = pneg %p695_p2  ;;  %p628_p11 = scmp.lt.s32.totalorder %s619_s26, %s619_s26 }
   0x8   : > { %p580_p5 = pnand %p583_p3, %p579_p4  ;;  %p629_p12 = por %p628_p11, %p627_p10 }
   0xa   : > { %p610_p6 = pneg %p580_p5 }
   0xc   : > { %p622_p8 = pnand %p620_p7, %p610_p6 }
   0xe   : > { %p623_p9 = pneg %p622_p8 }
  0x10   : > { %p630_p13 = pnand %p629_p12, %p623_p9 }
  0x12   : > { %633 = shalt.err (!%p630_p13)
}
  0x13   : > { %s647_s27 = smov 128   ;;  %s648_s28 = smov 8  }
  0x14   : > { %582 = dma.hbm_to_vmem [thread:$0]  (!%p580_p5), %s740_s3, 2048, %s198_s24, [#allocation3], %s647_s27, %s647_s27, %s648_s28  }
  0x15   : > { %226 = sbr.rel (%p695_p2) target bundleno = 599 (0x257), region = 44 }
  0x1a   : > { %639 = dma.done.wait (%p583_p3), [#allocation3], 2048  }
  0x1b   : > { %641 = vsyncadd (%p583_p3), [#allocation3], 4294965248  ;;  %p254_p0 = scmp.lt.s32.totalorder %s508_s22, 1  ;;  %v649_v0 = vmov 0   ;;  %v326_v2 = vld [vmem:[#allocation2 + $0x78] sm:$0xff]  ;;  %v650_v3 = vmov 0.0  }
  0x1c   : > { %599 = vset.pattern.permute.xlu0 %v649_v0  ;;  %540 = vmatprep.subr.mxu0 %v650_v3  ;;  %v325_v4 = vld [vmem:[#allocation2 + $0x70] sm:$0xff]  ;;  %vm651_vm0 = vmmov 0   ;;  %v324_v5 = vld [vmem:[#allocation2 + $0x68] sm:$0xff]  ;;  %v323_v6 = vld [vmem:[#allocation2 + $0x60] sm:$0xff]  ;;  %vm441_vm3 = vcmask 7168  }
  0x1d   : > { %s746_s22 = smov (!%p254_p0, %s508_s22), 1  ;;  %572 = vmatprep.mubr.msk.f32.mxu0 %vm651_vm0, %v650_v3  ;;  %541 = vmatpush3.msra.mxu0 %v326_v2  ;;  %v322_v7 = vld [vmem:[#allocation2 + $0x58] sm:$0xff]  ;;  %v321_v8 = vld [vmem:[#allocation2 + $0x50] sm:$0xff]  ;;  %v320_v9 = vld [vmem:[#allocation2 + $0x48] sm:$0xff] }
  0x1e   : > { %s515_s7 = sshll.u32 %s746_s22, 3  ;;  %542 = vmatprep.subr.mxu0 %v650_v3  ;;  %v319_v10 = vld [vmem:[#allocation2 + $0x40] sm:$0xff]  ;;  %v318_v11 = vld [vmem:[#allocation2 + $0x38] sm:$0xff]  ;;  %v317_v12 = vld [vmem:[#allocation2 + $0x30] sm:$0xff] }
  0x1f   : > { %s257_s10 = scalar_lea.vmem %s737_s0, %s515_s7  ;;  %543 = vmatpush3.msra.mxu0 %v325_v4  ;;  %v316_v13 = vld [vmem:[#allocation2 + $0x28] sm:$0xff]  ;;  %v315_v14 = vld [vmem:[#allocation2 + $0x20] sm:$0xff]  ;;  %v314_v15 = vld [vmem:[#allocation2 + $0x18] sm:$0xff]  ;;  %s261_s23 = scalar_lea.vmem %s743_s6, %s515_s7 }
  0x20   : > { %v262_v1 = vld [vmem:[%s257_s10] sm:$0xff]  ;;  %544 = vmatprep.subr.mxu0 %v650_v3  ;;  %v313_v16 = vld [vmem:[#allocation2 + $0x10] sm:$0xff]  ;;  %v312_v17 = vld [vmem:[#allocation2 + $0x8] sm:$0xff] }
  0x21   : > { %266 = vperm.xlu0 %599, %v262_v1   ;;  %545 = vmatpush3.msra.mxu0 %v324_v5  ;;  %v311_v18 = vld [vmem:[#allocation2] sm:$0xff] }
  0x22   : > { %546 = vmatprep.subr.mxu0 %v650_v3  ;;  %v517_v19 = vld [vmem:[%s738_s1] ss:$0 sm:$0xff] }
  0x23   : > { %547 = vmatpush3.msra.mxu0 %v323_v6  ;;  %v518_v20 = vld [vmem:[%s739_s2] ss:$0 sm:$0xff] }
  0x24   : > { %548 = vmatprep.subr.mxu0 %v650_v3  ;;  %v519_v49 = vld [vmem:[%s741_s4] ss:$0 sm:$0xff] }
  0x25   : > { %549 = vmatpush3.msra.mxu0 %v322_v7 }
  0x26   : > { %550 = vmatprep.subr.mxu0 %v650_v3 }
  0x27   : > { %551 = vmatpush3.msra.mxu0 %v321_v8 }
  0x28   : > { %552 = vmatprep.subr.mxu0 %v650_v3 }
  0x29   : > { %553 = vmatpush3.msra.mxu0 %v320_v9 }
  0x2a   : > { %554 = vmatprep.subr.mxu0 %v650_v3 }
  0x2b   : > { %555 = vmatpush3.msra.mxu0 %v319_v10 }
  0x2c   : > { %556 = vmatprep.subr.mxu0 %v650_v3 }
  0x2d   : > { %557 = vmatpush3.msra.mxu0 %v318_v11 }
  0x2e   : > { %558 = vmatprep.subr.mxu0 %v650_v3 }
  0x2f   : > { %559 = vmatpush3.msra.mxu0 %v317_v12 }
  0x30   : > { %560 = vmatprep.subr.mxu0 %v650_v3 }
  0x31   : > { %561 = vmatpush3.msra.mxu0 %v316_v13  ;;  %v520_v13 = vld [vmem:[%s742_s5] ss:$0 sm:$0xff] }
  0x32   : > { %562 = vmatprep.subr.mxu0 %v650_v3 }
  0x33   : > { %563 = vmatpush3.msra.mxu0 %v315_v14 }
  0x34   : > { %564 = vmatprep.subr.mxu0 %v650_v3 }
  0x35   : > { %565 = vmatpush3.msra.mxu0 %v314_v15 }
  0x36   : > { %566 = vmatprep.subr.mxu0 %v650_v3 }
  0x37   : > { %567 = vmatpush3.msra.mxu0 %v313_v16 }
  0x38   : > { %568 = vmatprep.subr.mxu0 %v650_v3 }
  0x39   : > { %569 = vmatpush3.msra.mxu0 %v312_v17 }
  0x3a   : > { %570 = vmatprep.subr.mxu0 %v650_v3 }
  0x3b   : > { %571 = vmatpush3.msra.mxu0 %v311_v18 }
  0x9c   : > { %v267_v21 = vpop.permute.xlu0 %266 }
  0x9d   : > { %v275_v22 = vmul.f32 %v517_v19, %v267_v21 }
  0x9f   : > { %v283_v23 = vadd.f32 %v518_v20, %v275_v22 }
  0xa1   : > { %v284_v24 = vmul.f32 0.70710677, %v283_v23  ;;  %v308_v46 = vmul.f32 0.5, %v283_v23 }
  0xa3   : > { %v285_v25 = vand.u32 2147483647, %v284_v24  ;;  %vm305_vm1 = vcmp.ge.f32.partialorder %v284_v24, 0.0 }
  0xa5   : > { %v286_v26 = vmul.f32 0.3275911, %v285_v25  ;;  %v299_v28 = vmul.f32 %v285_v25, %v285_v25 }
  0xa7   : > { %v287_v27 = vadd.f32 1.0, %v286_v26  ;;  %v300_v29 = vsub.f32 0.0, %v299_v28 }
  0xa9   : > { %600 = vrcp.f32 %v287_v27  ;;  %v301_v31 = vmul.f32 1.442695, %v300_v29 }
  0xab   : > { %602 = vpow2.f32 %v301_v31 }
  0xb6   : > { %v601_v30 = vpop.eup %600 }
  0xb7   : > { %v290_v32 = vmul.f32 1.0614054, %v601_v30 }
  0xb8   : > { %v603_v41 = vpop.eup %602 }
  0xb9   : > { %v291_v33 = vadd.f32 -1.4531521, %v290_v32 }
  0xbb   : > { %v292_v34 = vmul.f32 %v601_v30, %v291_v33 }
  0xbd   : > { %v293_v35 = vadd.f32 1.4214138, %v292_v34 }
  0xbf   : > { %v294_v36 = vmul.f32 %v601_v30, %v293_v35 }
  0xc1   : > { %v295_v37 = vadd.f32 -0.28449672, %v294_v36 }
  0xc3   : > { %v296_v38 = vmul.f32 %v601_v30, %v295_v37 }
  0xc5   : > { %v297_v39 = vadd.f32 0.2548296, %v296_v38 }
  0xc7   : > { %v298_v40 = vmul.f32 %v601_v30, %v297_v39 }
  0xc9   : > { %v303_v42 = vmul.f32 %v603_v41, %v298_v40 }
  0xcb   : > { %v304_v43 = vsub.f32 1.0, %v303_v42 }
  0xcd   : > { %v306_v44 = vsub.f32 0.0, %v304_v43 }
  0xcf   : > { %v307_v45 = vsel %vm305_vm1, %v304_v43, %v306_v44 }
  0xd0   : > { %v309_v47 = vadd.f32 1.0, %v307_v45 }
  0xd2   : > { %v310_v48 = vmul.f32 %v309_v47, %v308_v46 }
  0xd4   : > { %573 = vmatmul.mubr.f32.vlgmr.msra.gmra.mxu0 %v310_v48 }
 0x194   : > { %v400_v50 = vpop.f32.mrf.mxu0 }
 0x195   : > { %v401_v51 = vadd.f32 %v519_v49, %v400_v50 }
 0x196   : > { %v574_v52 = vpop.f32.mrf.mxu0 }
 0x197   : > { %v404_v53 = vmul.f32 0.70710677, %v401_v51  ;;  %v428_v11 = vmul.f32 0.5, %v401_v51 }
 0x199   : > { %v405_v54 = vand.u32 2147483647, %v404_v53  ;;  %vm425_vm2 = vcmp.ge.f32.partialorder %v404_v53, 0.0 }
 0x19b   : > { %v406_v55 = vmul.f32 0.3275911, %v405_v54  ;;  %v419_v57 = vmul.f32 %v405_v54, %v405_v54 }
 0x19d   : > { %v407_v56 = vadd.f32 1.0, %v406_v55  ;;  %v420_v58 = vsub.f32 0.0, %v419_v57 }
 0x19f   : > { %604 = vrcp.f32 %v407_v56  ;;  %v421_v60 = vmul.f32 1.442695, %v420_v58 }
 0x1a1   : > { %606 = vpow2.f32 %v421_v60 }
 0x1ac   : > { %v605_v59 = vpop.eup %604 }
 0x1ad   : > { %v410_v61 = vmul.f32 1.0614054, %v605_v59 }
 0x1ae   : > { %v607_v6 = vpop.eup %606 }
 0x1af   : > { %v411_v62 = vadd.f32 -1.4531521, %v410_v61 }
 0x1b1   : > { %v412_v63 = vmul.f32 %v605_v59, %v411_v62 }
 0x1b3   : > { %v413_v0 = vadd.f32 1.4214138, %v412_v63 }
 0x1b5   : > { %v414_v1 = vmul.f32 %v605_v59, %v413_v0 }
 0x1b7   : > { %v415_v2 = vadd.f32 -0.28449672, %v414_v1 }
 0x1b9   : > { %v416_v3 = vmul.f32 %v605_v59, %v415_v2 }
 0x1bb   : > { %v417_v4 = vadd.f32 0.2548296, %v416_v3 }
 0x1bd   : > { %v418_v5 = vmul.f32 %v605_v59, %v417_v4 }
 0x1bf   : > { %v423_v7 = vmul.f32 %v607_v6, %v418_v5 }
 0x1c1   : > { %v424_v8 = vsub.f32 1.0, %v423_v7 }
 0x1c3   : > { %v426_v9 = vsub.f32 0.0, %v424_v8 }
 0x1c5   : > { %v427_v10 = vsel %vm425_vm2, %v424_v8, %v426_v9 }
 0x1c6   : > { %v429_v12 = vadd.f32 1.0, %v427_v10 }
 0x1c8   : > { %v430_v14 = vmul.f32 %v429_v12, %v428_v11 }
 0x1ca   : > { %v438_v15 = vmul.f32 %v520_v13, %v430_v14 }
 0x1cc   : > { %439 = vadd.xlane.f32.xlu0 %v438_v15 }
 0x255   : > { %v440_v16 = vpop.xlane.xlu0 %439 }
 0x256   : > { %442 = vst.msk [vmem:[%s261_s23] sm:$0xff] %vm441_vm3, %v440_v16 }
 0x257 PF: > { %s17_s21 = sadd.s32 1, %s644_s21  }
 0x258   : > { %p14_p1 = scmp.ge.s32.totalorder %s17_s21, 4  }
 0x25a   :  { %16 = sbr.rel (!%p14_p1) target bundleno = 1 (0x1), region = 79 }
 0x25f   :  { %462 = vsyncpa [#allocation3], 1 }
 0x260   :  { %464 = vsyncpa [#allocation3 + $0x1], 1 }

</bundles_post_ra>
